<compile_context>
chip_gen: v6e
topology: v6e:2x2x1
jax: 0.10.0
libtpu: 0.0.40
codegen_flags: <defaults>
</compile_context>

<pallas_src>
import functools

import jax
import jax.numpy as jnp
from jax.experimental import pallas as pl
from jax.experimental.pallas import tpu as pltpu

EPS = 1e-5

_LANE = 128
_SUB = 8
# Rows per block. Kept <= 64 so the two (tbc, 128) f32 local partials plus the
# per-slab temporaries stay well within the 64-vreg budget (no spills).
_MAX_TBC = 64


def _cdiv(a, b):
    return -(-a // b)


def _round_up(x, m):
    return _cdiv(x, m) * m


def _vmem_budget():
    """Generation-aware per-input block budget and scoped-VMEM limit."""
    vmem_bytes = 64 * 1024 * 1024              # conservative default (v7x physical)
    try:
        vmem_bytes = int(pltpu.get_tpu_info().vmem_capacity_bytes)
    except Exception:
        pass
    # 2 inputs x 2 pipeline buffers x block (+ tiny outputs) must fit comfortably.
    block_bytes = max(1 << 20, min(8 << 20, vmem_bytes // 8))
    vmem_limit = int(min(vmem_bytes * 3 // 4, 4 * block_bytes + (16 << 20)))
    return block_bytes, vmem_limit


def _pick_tiles(bc, hw, itemsize, block_bytes):
    """Byte-budgeted tiling. Returns static tiling parameters (Python ints/bools)."""
    tbc = min(_round_up(bc, _SUB), _MAX_TBC)
    row_blocks = _cdiv(bc, tbc)

    # Lane tile sized purely from the per-input byte budget (multiple of 128).
    thw_cap = max(_LANE, (block_bytes // (tbc * itemsize)) // _LANE * _LANE)
    thw = min(_round_up(hw, _LANE), thw_cap)
    hw_tiles = _cdiv(hw, thw)

    # Single row block covering hw in one tile: split hw so v7x's second
    # TensorCore gets work and the DMA pipeline has >= 2 steps.
    if row_blocks == 1 and hw_tiles < 2 and hw > _LANE:
        thw = _round_up(_cdiv(hw, 2), _LANE)
        hw_tiles = _cdiv(hw, thw)

    n_splits = 2 if (row_blocks == 1 and hw_tiles >= 2) else 1
    k_per_split = _cdiv(hw_tiles, n_splits)
    covered = n_splits * k_per_split * thw
    mask_tail = covered != hw                   # any tail / duplicated tile -> mask
    clamp = n_splits * k_per_split > hw_tiles   # last split may index past the data
    return tbc, row_blocks, thw, hw_tiles, n_splits, k_per_split, mask_tail, clamp


def _nrd_partial_kernel(pre_ref, gt_ref, numer_ref, denom_ref, *,
                        thw, hw, k_per_split, mask_tail):
    # pre_ref / gt_ref     : (tbc, thw) VMEM tiles (original dtype; upcast per slab)
    # numer_ref / denom_ref: (1, tbc, 128) f32 lane-dense partial-sum accumulators
    #                        (resident across the innermost "arbitrary" hw axis)
    tbc = pre_ref.shape[0]
    k = pl.program_id(2)

    @pl.when(k == 0)
    def _():
        numer_ref[...] = jnp.zeros_like(numer_ref)
        denom_ref[...] = jnp.zeros_like(denom_ref)

    # Intended (unclamped) global element offset of this tile along hw.
    hw_base = (pl.program_id(1) * k_per_split + k) * thw

    def slab(off, pn, pd):
        p = pre_ref[:, pl.ds(off, _LANE)].astype(jnp.float32)
        g = gt_ref[:, pl.ds(off, _LANE)].astype(jnp.float32)
        if mask_tail:
            lane = jax.lax.broadcasted_iota(jnp.int32, (tbc, _LANE), 1)
            valid = (hw_base + off + lane) < hw
            p = jnp.where(valid, p, 0.0)
            g = jnp.where(valid, g, 0.0)
        diff = jnp.abs(p - g)
        pn = pn + diff * jnp.sqrt(diff)         # |p - g| ** 1.5 ; sqrt -> EUP slot
        pd = pd + p * p + g * g                 # fused denominator, single pass
        return pn, pd

    n_slabs = thw // _LANE
    zeros = jnp.zeros((tbc, _LANE), jnp.float32)
    if n_slabs <= 8:
        pn, pd = zeros, zeros
        for j in range(n_slabs):
            pn, pd = slab(j * _LANE, pn, pd)
    else:
        def body(j, carry):
            return slab(pl.multiple_of(j * _LANE, _LANE), *carry)
        pn, pd = jax.lax.fori_loop(0, n_slabs, body, (zeros, zeros), unroll=4)

    # Single (tbc, 128) accumulator read-modify-write per grid step.
    numer_ref[...] += pn[None, :, :]
    denom_ref[...] += pd[None, :, :]


def noise_robust_dice_loss(pre, gt, eps=EPS, block_bytes=None):
    """pre, gt: (b, c, h, w) arrays (f32 or bf16). Returns scalar f32 loss."""
    b, c, h, w = pre.shape
    assert gt.shape == pre.shape
    bc, hw = b * c, h * w
    pre2 = pre.reshape(bc, hw)
    gt2 = gt.reshape(bc, hw)

    itemsize = max(jnp.dtype(pre2.dtype).itemsize, jnp.dtype(gt2.dtype).itemsize)
    auto_block, vmem_limit = _vmem_budget()
    if block_bytes is None:
        block_bytes = auto_block

    (tbc, row_blocks, thw, hw_tiles, n_splits, k_per_split,
     mask_tail, clamp) = _pick_tiles(bc, hw, itemsize, block_bytes)
    rows_pad = row_blocks * tbc

    def in_map(i, s, k):
        kg = s * k_per_split + k
        if clamp:
            # Fully out-of-range tiles re-read the last valid tile; the
            # in-kernel mask (based on the *intended* offset) zeroes them out.
            kg = jnp.minimum(kg, hw_tiles - 1)
        return (i, kg)

    def out_map(i, s, k):
        return (s, i, 0)

    kernel = functools.partial(_nrd_partial_kernel, thw=thw, hw=hw,
                               k_per_split=k_per_split, mask_tail=mask_tail)

    part_shape = jax.ShapeDtypeStruct((n_splits, rows_pad, _LANE), jnp.float32)
    numer_p, denom_p = pl.pallas_call(
        kernel,
        out_shape=(part_shape, part_shape),
        grid_spec=pltpu.PrefetchScalarGridSpec(
            num_scalar_prefetch=0,
            grid=(row_blocks, n_splits, k_per_split),
            in_specs=[
                pl.BlockSpec((tbc, thw), in_map),
                pl.BlockSpec((tbc, thw), in_map),
            ],
            out_specs=[
                pl.BlockSpec((1, tbc, _LANE), out_map),
                pl.BlockSpec((1, tbc, _LANE), out_map),
            ],
        ),
        compiler_params=pltpu.CompilerParams(
            dimension_semantics=("parallel", "parallel", "arbitrary"),
            vmem_limit_bytes=vmem_limit,
        ),
        cost_estimate=pl.CostEstimate(
            flops=8 * bc * hw,
            transcendentals=bc * hw,
            bytes_accessed=2 * bc * hw * itemsize
                           + 2 * n_splits * rows_pad * _LANE * 4,
        ),
    )(pre2, gt2)

    # Tiny finalization in the wrapper: combine hw splits + lanes, drop padded
    # rows (which may hold garbage from edge blocks), exact divide, mean.
    numer = jnp.sum(numer_p, axis=(0, 2))[:bc]
    denom = jnp.sum(denom_p, axis=(0, 2))[:bc]
    return jnp.mean(numer / (denom + eps))


def _reference(pre, gt, eps=EPS):
    b, c, h, w = pre.shape
    pre = pre.astype(jnp.float32)
    gt = gt.astype(jnp.float32)
    diff = jnp.abs(pre - gt) ** 1.5
    pre_sum = jnp.sum(pre.reshape(b, c, -1) ** 2, axis=2)
    gt_sum = jnp.sum(gt.reshape(b, c, -1) ** 2, axis=2)
    numer_sum = jnp.sum(diff.reshape(b, c, -1), axis=2)
    return jnp.mean(numer_sum / (pre_sum + gt_sum + eps))


def _check(key, shape, dtype=jnp.float32, block_bytes=None, tol=2e-5):
    k1, k2 = jax.random.split(key)
    pre = jax.nn.sigmoid(jax.random.normal(k1, shape, dtype=jnp.float32))
    gt = (jax.random.uniform(k2, shape) > 0.5).astype(jnp.float32)
    pre = pre.astype(dtype)
    gt = gt.astype(dtype)
    loss = noise_robust_dice_loss(pre, gt, block_bytes=block_bytes)
    jax.block_until_ready(loss)
    ref = _reference(pre, gt)
    assert jnp.allclose(loss, ref, atol=tol, rtol=tol), (shape, dtype, loss, ref)


if __name__ == "__main__":
    key = jax.random.PRNGKey(0)
    keys = jax.random.split(key, 6)

    # 1) Aligned case, single row block -> parallel hw split path (v7x 2-TC).
    _check(keys[0], (2, 4, 16, 16))
    # 2) Unaligned bc and hw -> in-kernel tail masking + partial row block.
    _check(keys[1], (2, 3, 10, 12))
    # 3) Larger hw -> lax.fori_loop slab path (n_slabs > 8), aligned split.
    _check(keys[2], (2, 3, 64, 64))
    # 4) Tiny forced block budget -> multi-step hw axis + clamped duplicate
    #    tile in the second split (fully masked) + tail masking.
    _check(keys[3], (1, 2, 16, 72), block_bytes=8192)
    # 5) Many (b*c) rows -> multiple row blocks, partial last row block.
    _check(keys[4], (10, 13, 8, 24))
    # 6) bf16 input path (half the HBM bytes; f32 accumulation in-kernel).
    _check(keys[5], (2, 4, 16, 16), dtype=jnp.bfloat16)

    print("KERNEL_OK")
</pallas_src>

<mosaic_0001>
module attributes {stable_mosaic.version = 11 : i64} {
  func.func @_nrd_partial_kernel(%arg0: i32, %arg1: i32, %arg2: i32, %arg3: memref<8x128xf32, #tpu.memory_space<vmem>>, %arg4: memref<8x128xf32, #tpu.memory_space<vmem>>, %arg5: memref<1x8x128xf32, #tpu.memory_space<vmem>>, %arg6: memref<1x8x128xf32, #tpu.memory_space<vmem>>) attributes {dimension_semantics = [#tpu.dimension_semantics<parallel>, #tpu.dimension_semantics<parallel>, #tpu.dimension_semantics<arbitrary>], iteration_bounds = array<i64: 1, 2, 1>, scalar_prefetch = 0 : i64, scratch_operands = 0 : i64, tpu.core_type = #tpu.core_type<tc>, window_params = [{transform_indices = @transform_0, window_bounds = array<i64: 8, 128>}, {transform_indices = @transform_1, window_bounds = array<i64: 8, 128>}, {transform_indices = @transform_2, window_bounds = array<i64: 1, 8, 128>}, {transform_indices = @transform_3, window_bounds = array<i64: 1, 8, 128>}]} {
    %c0_i32 = arith.constant 0 : i32
    %0 = arith.cmpi eq, %arg2, %c0_i32 : i32
    %1 = arith.extui %0 : i1 to i32
    %c0_i32_0 = arith.constant 0 : i32
    %2 = arith.cmpi ne, %1, %c0_i32_0 : i32
    scf.if %2 {
      %cst_16 = arith.constant 0.000000e+00 : f32
      %23 = vector.broadcast %cst_16 : f32 to vector<1x8x128xf32>
      %c0_17 = arith.constant 0 : index
      %c0_18 = arith.constant 0 : index
      %c0_19 = arith.constant 0 : index
      %24 = vector.load %arg5[%c0_17, %c0_18, %c0_19] : memref<1x8x128xf32, #tpu.memory_space<vmem>>, vector<1x8x128xf32>
      tpu.vector_store %arg5[%c0_17, %c0_18, %c0_19], %23 {strides = array<i32>} : memref<1x8x128xf32, #tpu.memory_space<vmem>>, vector<1x8x128xf32>,
      %cst_20 = arith.constant 0.000000e+00 : f32
      %25 = vector.broadcast %cst_20 : f32 to vector<1x8x128xf32>
      %c0_21 = arith.constant 0 : index
      %c0_22 = arith.constant 0 : index
      %c0_23 = arith.constant 0 : index
      %26 = vector.load %arg6[%c0_21, %c0_22, %c0_23] : memref<1x8x128xf32, #tpu.memory_space<vmem>>, vector<1x8x128xf32>
      tpu.vector_store %arg6[%c0_21, %c0_22, %c0_23], %25 {strides = array<i32>} : memref<1x8x128xf32, #tpu.memory_space<vmem>>, vector<1x8x128xf32>,
    } else {
    }
    %cst = arith.constant 0.000000e+00 : f32
    %3 = vector.broadcast %cst : f32 to vector<8x128xf32>
    %c0 = arith.constant 0 : index
    %c0_1 = arith.constant 0 : index
    %4 = vector.load %arg3[%c0, %c0_1] : memref<8x128xf32, #tpu.memory_space<vmem>>, vector<8x128xf32>
    %c0_2 = arith.constant 0 : index
    %c0_3 = arith.constant 0 : index
    %5 = vector.load %arg4[%c0_2, %c0_3] : memref<8x128xf32, #tpu.memory_space<vmem>>, vector<8x128xf32>
    %6 = arith.subf %4, %5 : vector<8x128xf32>
    %7 = math.absf %6 : vector<8x128xf32>
    %8 = math.sqrt %7 : vector<8x128xf32>
    %9 = arith.mulf %7, %8 : vector<8x128xf32>
    %10 = arith.addf %3, %9 : vector<8x128xf32>
    %11 = arith.mulf %4, %4 : vector<8x128xf32>
    %12 = arith.addf %3, %11 : vector<8x128xf32>
    %13 = arith.mulf %5, %5 : vector<8x128xf32>
    %14 = arith.addf %12, %13 : vector<8x128xf32>
    %c0_4 = arith.constant 0 : index
    %c0_5 = arith.constant 0 : index
    %c0_6 = arith.constant 0 : index
    %15 = vector.load %arg5[%c0_4, %c0_5, %c0_6] : memref<1x8x128xf32, #tpu.memory_space<vmem>>, vector<1x8x128xf32>
    %16 = vector.shape_cast %10 : vector<8x128xf32> to vector<1x8x128xf32>
    %17 = arith.addf %15, %16 : vector<1x8x128xf32>
    %c0_7 = arith.constant 0 : index
    %c0_8 = arith.constant 0 : index
    %c0_9 = arith.constant 0 : index
    %18 = vector.load %arg5[%c0_7, %c0_8, %c0_9] : memref<1x8x128xf32, #tpu.memory_space<vmem>>, vector<1x8x128xf32>
    tpu.vector_store %arg5[%c0_7, %c0_8, %c0_9], %17 {strides = array<i32>} : memref<1x8x128xf32, #tpu.memory_space<vmem>>, vector<1x8x128xf32>,
    %c0_10 = arith.constant 0 : index
    %c0_11 = arith.constant 0 : index
    %c0_12 = arith.constant 0 : index
    %19 = vector.load %arg6[%c0_10, %c0_11, %c0_12] : memref<1x8x128xf32, #tpu.memory_space<vmem>>, vector<1x8x128xf32>
    %20 = vector.shape_cast %14 : vector<8x128xf32> to vector<1x8x128xf32>
    %21 = arith.addf %19, %20 : vector<1x8x128xf32>
    %c0_13 = arith.constant 0 : index
    %c0_14 = arith.constant 0 : index
    %c0_15 = arith.constant 0 : index
    %22 = vector.load %arg6[%c0_13, %c0_14, %c0_15] : memref<1x8x128xf32, #tpu.memory_space<vmem>>, vector<1x8x128xf32>
    tpu.vector_store %arg6[%c0_13, %c0_14, %c0_15], %21 {strides = array<i32>} : memref<1x8x128xf32, #tpu.memory_space<vmem>>, vector<1x8x128xf32>,
    return
  }
  func.func @transform_0(%arg0: i32, %arg1: i32, %arg2: i32) -> (i32, i32) {
    %c1_i32 = arith.constant 1 : i32
    %0 = arith.muli %arg1, %c1_i32 : i32
    %1 = arith.addi %0, %arg2 : i32
    %c0_i32 = arith.constant 0 : i32
    return %arg0, %1 : i32, i32
  }
  func.func @transform_1(%arg0: i32, %arg1: i32, %arg2: i32) -> (i32, i32) {
    %c1_i32 = arith.constant 1 : i32
    %0 = arith.muli %arg1, %c1_i32 : i32
    %1 = arith.addi %0, %arg2 : i32
    %c0_i32 = arith.constant 0 : i32
    return %arg0, %1 : i32, i32
  }
  func.func @transform_2(%arg0: i32, %arg1: i32, %arg2: i32) -> (i32, i32, i32) {
    %c0_i32 = arith.constant 0 : i32
    %c0_i32_0 = arith.constant 0 : i32
    return %arg1, %arg0, %c0_i32 : i32, i32, i32
  }
  func.func @transform_3(%arg0: i32, %arg1: i32, %arg2: i32) -> (i32, i32, i32) {
    %c0_i32 = arith.constant 0 : i32
    %c0_i32_0 = arith.constant 0 : i32
    return %arg1, %arg0, %c0_i32 : i32, i32, i32
  }
}

</mosaic_0001>

<bundles_post_ra>
// kernel: tpu_custom_call.1
= control target key start
LH: loop header
LB: loop body
LE: loop exit
PB: predicated region body
PF: predicated region fallthrough
CT: control target
= control target key end

     0   :  { %9 = vsyncpa [#allocation3], 0  ;;  %s957_s0 = inlined_call_operand.hbm [shape: f32[8,256], index: 0, kind: input, shape index: {}]   ;;  %s958_s1 = inlined_call_operand.hbm [shape: f32[8,256], index: 1, kind: input, shape index: {}]   ;;  %s959_s2 = inlined_call_operand.hbm [shape: f32[2,8,128], index: 2, kind: output, shape index: {0}]   ;;  %s960_s3 = inlined_call_operand.hbm [shape: f32[2,8,128], index: 3, kind: output, shape index: {1}]  }
   0x1   :  { %11 = vsyncpa [#allocation3 + $0x1], 0 }
   0x2   :  { %12 = vsyncpa [#allocation6], 0 }
   0x3   :  { %14 = vsyncpa [#allocation6 + $0x1], 0 }
   0x4   :  { %15 = vsyncpa [#allocation4], 0 }
   0x5   :  { %17 = vsyncpa [#allocation4 + $0x1], 0 }
   0x6   :  { %18 = vsyncpa [#allocation9], 0 }
   0x7   :  { %20 = vsyncpa [#allocation9 + $0x1], 0  ;;  %s770_s12 = smov 0   ;;  %s772_s13 = smov 0  }
   0x8   :  { %s774_s14 = smov 0   ;;  %s776_s15 = smov 0  }
   0x9   :  { %s778_s16 = smov 0   ;;  %s780_s17 = smov 0  }
   0xa LB: > { %s480_s18 = sadd.s32 4294967295, %s744_s17   ;;  %s481_s19 = sadd.s32 4294967294, %s744_s17   ;;  %s744_s17 = sphi %s780_s17, %s26_s17   ;;  %s740_s16 = sphi %s778_s16, %s972_s16   ;;  %s736_s15 = sphi %s776_s15, %s971_s15   ;;  %s732_s14 = sphi %s774_s14, %s970_s14   ;;  %s728_s13 = sphi %s772_s13, %s969_s13   ;;  %s724_s12 = sphi %s770_s12, %s968_s12  }
   0xb   : > { %s41_s20 = sadd.s32 1, %s740_s16  ;;  %s56_s21 = sadd.s32 1, %s732_s14 }
   0xc   : > { %p43_p0 = scmp.ge.s32.totalorder %s41_s20, 2  ;;  %p63_p1 = scmp.ne.s32.totalorder %s732_s14, %s728_s13 }
   0xd   : > { %p64_p2 = scmp.eq.s32.totalorder %s744_s17, 0  ;;  %p69_p3 = scmp.ne.s32.totalorder %s728_s13, %s724_s12 }
   0xe   : > { %s974_s20 = smov (%p43_p0, %s41_s20), 0  ;;  %p70_p5 = scmp.eq.s32.totalorder %s480_s18, 0 }
   0xf   : > { %p811_p4 = por %p64_p2, %p63_p1  ;;  %s52_s23 = ssub.s32 %s740_s16, %s974_s20 }
  0x10   : > { %p125_p6 = scmp.eq.s32.totalorder %s480_s18, 1  ;;  %p54_p7 = scmp.eq.s32.totalorder %s52_s23, 0 }
  0x11   : > { %p817_p8 = por %p70_p5, %p69_p3  ;;  %p131_p10 = scmp.eq.s32.totalorder %s481_s19, 1 }
  0x12   : > { %p821_p9 = por %p125_p6, %p63_p1  ;;  %p521_p13 = scmp.lt.s32.totalorder %s744_s17, 2 }
  0x13   : > { %s826_s26 = scalar_select %p54_p7, %s732_s14, %s56_s21  }
  0x14   : > { %p828_p11 = por %p131_p10, %p69_p3  ;;  %s835_s28 = sand.u32 1, %s732_s14  }
  0x15   : > { %s484_s29 = sshll.u32 %s835_s28, 3  ;;  %s485_s30 = sshll.u32 %s740_s16, 7 }
  0x16   : > { %s191_s6 = scalar_lea.hbm %s957_s0, %s485_s30  ;;  %s183_s7 = scalar_lea.vmem [#allocation2], %s484_s29 }
  0x17   : > { %s193_s8 = sshll.u32 %s183_s7, 4  ;;  %p844_p0 = pnand %p521_p13, %p811_p4  ;;  %s194_s8 = int_to_ptr.vmem [resolvable:$true] %s193_s8 }
  0x18   : > { %p488_p1 = scmp.ge.s32.totalorder %s744_s17, 1  ;;  %p219_p2 = scmp.lt.s32.totalorder %s744_s17, 3 }
  0x19   : > { %s180_s10 = scalar_lea.sflag [#allocation3], %s835_s28  ;;  %p576_p3 = pneg %p844_p0 }
  0x1a   : > { %s587_s11 = scalar_lea.vmem %s194_s8, 128  ;;  %s746_s18 = smov [#allocation2]  }
  0x1b   : > { %p588_p5 = scmp.ne.s32.totalorder %s194_s8, %s587_s11  ;;  %s592_s19 = sshll.u32 %s746_s18, 4  ;;  %s593_s19 = int_to_ptr.vmem [resolvable:$false] %s592_s19 }
  0x1c   : > { %s594_s21 = scalar_lea.vmem %s593_s19, 256  ;;  %p595_p4 = scmp.lt.s32.totalorder %s194_s8, %s593_s19 }
  0x1d   : > { %p590_p6 = pnand %p588_p5, %p576_p3  ;;  %p596_p10 = scmp.lt.s32.totalorder %s594_s21, %s587_s11 }
  0x1f   : > { %p591_p7 = pneg %p590_p6  ;;  %p597_p13 = por %p596_p10, %p595_p4 }
  0x21   : > { %p598_p12 = pnand %p597_p13, %p591_p7 }
  0x23   : > { %601 = shalt.err (!%p598_p12)
}
  0x24   : > { %510 = dma.hbm_to_vmem [thread:$0]  (!%p844_p0), %s191_s6, 128, %s194_s8, %s180_s10  }
  0x25   : > { %p862_p5 = pnand %p488_p1, %p219_p2  ;;  %s212_s5 = scalar_lea.hbm %s958_s1, %s485_s30 }
  0x26   : > { %s204_s7 = scalar_lea.vmem [#allocation5], %s484_s29  ;;  %s201_s18 = scalar_lea.sflag [#allocation6], %s835_s28 }
  0x27   : > { %s214_s11 = sshll.u32 %s204_s7, 4  ;;  %s747_s6 = smov [#allocation5]   ;;  %s215_s11 = int_to_ptr.vmem [resolvable:$true] %s214_s11 }
  0x28   : > { %s615_s19 = scalar_lea.vmem %s215_s11, 128  ;;  %s620_s8 = sshll.u32 %s747_s6, 4  ;;  %s621_s8 = int_to_ptr.vmem [resolvable:$false] %s620_s8 }
  0x29   : > { %p616_p12 = scmp.ne.s32.totalorder %s215_s11, %s615_s19  ;;  %s622_s10 = scalar_lea.vmem %s621_s8, 256 }
  0x2a   : > { %p623_p1 = scmp.lt.s32.totalorder %s215_s11, %s621_s8  ;;  %p624_p2 = scmp.lt.s32.totalorder %s622_s10, %s615_s19 }
  0x2b   : > { %p618_p6 = pnand %p616_p12, %p576_p3 }
  0x2c   : > { %p625_p4 = por %p624_p2, %p623_p1 }
  0x2d   : > { %p619_p7 = pneg %p618_p6 }
  0x2f   : > { %p626_p10 = pnand %p625_p4, %p619_p7 }
  0x31   : > { %629 = shalt.err (!%p626_p10)
}
  0x32   : > { %513 = dma.hbm_to_vmem [thread:$0]  (!%p844_p0), %s212_s5, 128, %s215_s11, %s201_s18  }
  0x33   : > { %223 = sbr.rel (%p862_p5) target bundleno = 106 (0x6a), region = 28  ;;  %s878_s28 = sand.u32 (!%p862_p5), 1, %s728_s13  }
  0x34   : > { %s881_s29 = sshll.u32 (!%p862_p5), %s878_s28, 3  ;;  %s226_s30 = scalar_lea.sflag (!%p862_p5), [#allocation3], %s878_s28 }
  0x35   : > { %s229_s21 = scalar_lea.vmem (!%p862_p5), [#allocation2], %s881_s29 }
  0x38   : > { %707 = dma.done.wait (%p817_p8), %s226_s30, 128  }
  0x39   : > { %709 = vsyncadd (%p817_p8), %s226_s30, 4294967168  ;;  %s235_s9 = scalar_lea.sflag [#allocation6], %s878_s28  ;;  %s238_s22 = scalar_lea.vmem [#allocation5], %s881_s29 }
  0x3a   : > { %711 = dma.done.wait (%p817_p8), %s235_s9, 128  }
  0x3b   : > { %713 = vsyncadd (%p817_p8), %s235_s9, 4294967168  ;;  %v279_v0 = vld [vmem:[%s229_s21] sm:$0xff]  ;;  %v280_v1 = vld [vmem:[%s238_s22] sm:$0xff]  ;;  %s495_s23 = sshll.u32 %s736_s15, 7  ;;  %s270_s4 = scalar_lea.vmem [#allocation8], %s881_s29 }
  0x3c   : > { %v281_v2 = vsub.f32 %v279_v0, %v280_v1  ;;  %v292_v3 = vmul.f32 %v279_v0, %v279_v0  ;;  %v294_v4 = vmul.f32 %v280_v1, %v280_v1  ;;  %s336_s5 = sshll.u32 %s270_s4, 4  ;;  %s334_s11 = scalar_lea.hbm %s960_s3, %s495_s23  ;;  %s337_s5 = int_to_ptr.vmem [resolvable:$true] %s336_s5 }
  0x3d   : > { %s308_s18 = scalar_lea.sflag [#allocation9], %s878_s28  ;;  %s630_s19 = scalar_lea.vmem %s337_s5, 128 }
  0x3e   : > { %v282_v5 = vand.u32 2147483647, %v281_v2  ;;  %v295_v6 = vadd.f32 %v294_v4, %v292_v3  ;;  %p631_p8 = scmp.ne.s32.totalorder %s337_s5, %s630_s19  ;;  %s748_s6 = smov [#allocation8]  }
  0x3f   : > { %s634_s8 = sshll.u32 %s748_s6, 4  ;;  %s635_s8 = int_to_ptr.vmem [resolvable:$false] %s634_s8 }
  0x40   : > { %572 = vrsqrt.f32 %v282_v5  ;;  %301 = vst [vmem:[%s270_s4] sm:$0xff] %v295_v6  ;;  %p632_p0 = pnand %p631_p8, %p821_p9  ;;  %s636_s10 = scalar_lea.vmem %s635_s8, 256 }
  0x41   : > { %p637_p13 = scmp.lt.s32.totalorder %s337_s5, %s635_s8  ;;  %p638_p5 = scmp.lt.s32.totalorder %s636_s10, %s630_s19 }
  0x42   : > { %p633_p3 = pneg %p632_p0 }
  0x43   : > { %p639_p12 = por %p638_p5, %p637_p13 }
  0x45   : > { %p640_p6 = pnand %p639_p12, %p633_p3 }
  0x47   : > { %643 = shalt.err (!%p640_p6)
}
  0x48   : > { %s644_s30 = scalar_lea.hbm %s334_s11, 128  ;;  %s648_s22 = scalar_lea.hbm %s960_s3, 256 }
  0x49   : > { %p645_p7 = scmp.ne.s32.totalorder %s334_s11, %s644_s30  ;;  %p649_p4 = scmp.lt.s32.totalorder %s334_s11, %s960_s3 }
  0x4a   : > { %p650_p10 = scmp.lt.s32.totalorder %s648_s22, %s644_s30 }
  0x4b   : > { %p646_p1 = pnand %p645_p7, %p821_p9 }
  0x4c   : > { %p651_p8 = por %p650_p10, %p649_p4 }
  0x4d   : > { %p647_p2 = pneg %p646_p1 }
  0x4f   : > { %p652_p0 = pnand %p651_p8, %p647_p2 }
  0x51   : > { %655 = shalt.err (!%p652_p0)
}
  0x52   : > { %504 = dma.vmem_to_hbm [thread:$0]  (%p821_p9), %s337_s5, 128, %s334_s11, %s308_s18   ;;  %v573_v7 = vpop.eup %572  ;;  %vm285_vm0 = vcmp.eq.f32.partialorder %v282_v5, inf  ;;  %v288_v8 = vand.u32 2147483648, %v282_v5  ;;  %vm287_vm1 = vcmp.eq.f32.partialorder %v282_v5, 0.0 }
  0x53   : > { %v284_v9 = vmul.f32 %v573_v7, %v282_v5  ;;  %s263_s24 = scalar_lea.vmem [#allocation7], %s881_s29  ;;  %s320_s10 = scalar_lea.hbm %s959_s2, %s495_s23 }
  0x54   : > { %s322_s19 = sshll.u32 %s263_s24, 4  ;;  %s303_s30 = scalar_lea.sflag [#allocation4], %s878_s28  ;;  %s323_s19 = int_to_ptr.vmem [resolvable:$true] %s322_s19 }
  0x55   : > { %v286_v10 = vsel %vm285_vm0, %v282_v5, %v284_v9  ;;  %s656_s5 = scalar_lea.vmem %s323_s19, 128  ;;  %s749_s11 = smov [#allocation7]  }
  0x56   : > { %v289_v11 = vsel %vm287_vm1, %v288_v8, %v286_v10  ;;  %p657_p3 = scmp.ne.s32.totalorder %s323_s19, %s656_s5  ;;  %s660_s18 = sshll.u32 %s749_s11, 4  ;;  %s661_s18 = int_to_ptr.vmem [resolvable:$false] %s660_s18 }
  0x57   : > { %v290_v12 = vmul.f32 %v289_v11, %v282_v5  ;;  %s662_s21 = scalar_lea.vmem %s661_s18, 256  ;;  %p663_p12 = scmp.lt.s32.totalorder %s323_s19, %s661_s18 }
  0x58   : > { %p658_p13 = pnand %p657_p3, %p821_p9  ;;  %p664_p6 = scmp.lt.s32.totalorder %s662_s21, %s656_s5 }
  0x59   : > { %298 = vst [vmem:[%s263_s24] sm:$0xff] %v290_v12 }
  0x5a   : > { %p659_p5 = pneg %p658_p13  ;;  %p665_p7 = por %p664_p6, %p663_p12 }
  0x5c   : > { %p666_p1 = pnand %p665_p7, %p659_p5 }
  0x5e   : > { %669 = shalt.err (!%p666_p1)
}
  0x5f   : > { %s670_s15 = scalar_lea.hbm %s320_s10, 128  ;;  %s674_s23 = scalar_lea.hbm %s959_s2, 256 }
  0x60   : > { %p671_p2 = scmp.ne.s32.totalorder %s320_s10, %s670_s15  ;;  %p675_p8 = scmp.lt.s32.totalorder %s320_s10, %s959_s2 }
  0x61   : > { %p676_p0 = scmp.lt.s32.totalorder %s674_s23, %s670_s15 }
  0x62   : > { %p672_p4 = pnand %p671_p2, %p821_p9 }
  0x63   : > { %p677_p3 = por %p676_p0, %p675_p8 }
  0x64   : > { %p673_p10 = pneg %p672_p4 }
  0x66   : > { %p678_p13 = pnand %p677_p3, %p673_p10 }
  0x68   : > { %681 = shalt.err (!%p678_p13)
}
  0x69   : > { %503 = dma.vmem_to_hbm [thread:$0]  (%p821_p9), %s323_s19, 128, %s320_s10, %s303_s30  }
  0x6a PF: > { %s348_s4 = sand.u32 1, %s724_s12   ;;  %p967_p5 = scmp.ge.s32.totalorder %s744_s17, 2 }
  0x6b   : > { %s349_s7 = scalar_lea.sflag [#allocation4], %s348_s4 }
  0x6c   : > { %p515_p12 = pnand %p967_p5, %p828_p11 }
  0x6e   : > { %p516_p6 = pneg %p515_p12 }
  0x70   : > { %715 = dma.done.wait (%p516_p6), %s349_s7, 128  }
  0x71   : > { %717 = vsyncadd (%p516_p6), %s349_s7, 4294967168  ;;  %s358_s24 = scalar_lea.sflag [#allocation9], %s348_s4 }
  0x72   : > { %719 = dma.done.wait (%p516_p6), %s358_s24, 128  }
  0x73   : > { %721 = vsyncadd (%p516_p6), %s358_s24, 4294967168  ;;  %s26_s17 = sadd.s32 1, %s744_s17   ;;  %s968_s12 = smov %s728_s13 }
  0x74   : > { %p23_p7 = scmp.ge.s32.totalorder %s26_s17, 4   ;;  %s969_s13 = smov %s732_s14 }
  0x75   : > { %s970_s14 = smov %s826_s26  ;;  %s971_s15 = smov %s740_s16 }
  0x76   : > { %s972_s16 = smov %s974_s20  ;;  %25 = sbr.rel (!%p23_p7) target bundleno = 10 (0xa), region = 107 }
  0x7b   :  { %363 = vsyncpa [#allocation3], 1 }
  0x7c   :  { %365 = vsyncpa [#allocation3 + $0x1], 1 }
  0x7d   :  { %366 = vsyncpa [#allocation6], 1 }
  0x7e   :  { %368 = vsyncpa [#allocation6 + $0x1], 1 }
  0x7f   :  { %369 = vsyncpa [#allocation4], 1 }
  0x80   :  { %371 = vsyncpa [#allocation4 + $0x1], 1 }
  0x81   :  { %372 = vsyncpa [#allocation9], 1 }
  0x82   :  { %374 = vsyncpa [#allocation9 + $0x1], 1 }

</bundles_post_ra>
